<compile_context>
chip_gen: v5e
topology: v5e:2x2
jax: 0.10.0
libtpu: 0.0.40
codegen_flags: <defaults>
</compile_context>

<pallas_src>
import jax
import jax.numpy as jnp
import numpy as np
from jax.experimental import pallas as pl
from jax.experimental.pallas import tpu as pltpu

LN_EPS = 1e-5  # PyTorch nn.LayerNorm default eps


def _gather_rows_kernel(ids_ref, table_ref, out_ref):
    """out[i, :] = table[ids[i], :] (table already holds the final activations)."""
    # ids_ref:   (B,)   int32, SMEM
    # table_ref: (V, H) f32,   VMEM — precomputed relu(LN(emb @ W + b)*gamma + beta)
    # out_ref:   (B, H) f32,   VMEM
    B = out_ref.shape[0]
    V = table_ref.shape[0]
    rows = []
    for i in range(B):                       # B is small & static -> fully unrolled
        idx = jnp.clip(ids_ref[i], 0, V - 1)
        rows.append(table_ref[pl.ds(idx, 1), :])
    out_ref[...] = jnp.concatenate(rows, axis=0).astype(out_ref.dtype)


def _fused_encode_kernel(ids_ref, fused_ref, out_ref):
    """Row gather from (table @ W) + bias + LayerNorm + ReLU in one kernel."""
    # ids_ref:   (B,)     int32, SMEM
    # fused_ref: (V+3, H) f32,   VMEM — rows [0,V): table @ W ; row V: linear bias;
    #                                   row V+1: LN gamma ; row V+2: LN beta
    # out_ref:   (B, H)   f32,   VMEM
    B = out_ref.shape[0]
    V = fused_ref.shape[0] - 3
    bias = fused_ref[pl.ds(V, 1), :]          # (1, H)
    gamma = fused_ref[pl.ds(V + 1, 1), :]
    beta = fused_ref[pl.ds(V + 2, 1), :]

    rows = []
    for i in range(B):                        # direct gather: no one-hot / MXU pass
        idx = jnp.clip(ids_ref[i], 0, V - 1)
        rows.append(fused_ref[pl.ds(idx, 1), :])
    h = jnp.concatenate(rows, axis=0) + bias  # (B, H): embedding @ W + b

    # LayerNorm over the last dim; reuse the centered term.
    mu = jnp.mean(h, axis=-1, keepdims=True)
    centered = h - mu
    var = jnp.mean(centered * centered, axis=-1, keepdims=True)
    hn = centered * jax.lax.rsqrt(var + LN_EPS)
    hn = hn * gamma + beta
    # nn.Dropout(p=0.1) is identity in eval mode.
    # TODO(synk): training-mode dropout (pltpu.prng_seed + pltpu.prng_random_bits
    # mask) not implemented.
    out_ref[...] = jnp.maximum(hn, 0.0).astype(out_ref.dtype)


def make_task_encoder(table, w, b, gamma, beta, *, precompute=True):
    """Build the per-call encoder. All parameter prep runs here, ONCE.

    precompute=True  -> whole module collapsed into a (V, H) activation table;
                        kernel is a pure row gather (eval mode, frozen params).
    precompute=False -> gather + bias + LN + ReLU computed inside the kernel
                        from a single (V+3, H) folded parameter block.
    """
    table = table.astype(jnp.float32)
    w = w.astype(jnp.float32)
    b = b.astype(jnp.float32)
    gamma = gamma.astype(jnp.float32)
    beta = beta.astype(jnp.float32)
    H = w.shape[1]

    if precompute:
        h = jnp.dot(table, w, preferred_element_type=jnp.float32) + b
        mu = jnp.mean(h, axis=-1, keepdims=True)
        var = jnp.mean((h - mu) ** 2, axis=-1, keepdims=True)
        hn = (h - mu) * jax.lax.rsqrt(var + LN_EPS) * gamma + beta
        payload = jnp.maximum(hn, 0.0)                                    # (V, H)
        kernel = _gather_rows_kernel
    else:
        fused = jnp.dot(table, w, preferred_element_type=jnp.float32)     # (V, H)
        payload = jnp.concatenate(
            [fused, b[None, :], gamma[None, :], beta[None, :]], axis=0)   # (V+3, H)
        kernel = _fused_encode_kernel
    payload = jax.block_until_ready(payload)  # materialize once, at init

    smem = pl.BlockSpec(memory_space=pltpu.MemorySpace.SMEM)
    vmem = pl.BlockSpec(memory_space=pltpu.MemorySpace.VMEM)

    @jax.jit
    def encode(task_ids):
        ids = task_ids.squeeze(-1) if task_ids.ndim > 1 else task_ids
        ids = ids.astype(jnp.int32)
        B = ids.shape[0]
        return pl.pallas_call(
            kernel,
            out_shape=jax.ShapeDtypeStruct((B, H), jnp.float32),
            in_specs=[smem, vmem],
            out_specs=vmem,
        )(ids, payload)

    return encode


def task_encoder_ref(task_ids, table, w, b, gamma, beta):
    """Pure-JAX reference mirroring the PyTorch module (eval mode)."""
    ids = task_ids.squeeze(-1) if task_ids.ndim > 1 else task_ids
    x = jnp.take(table, ids, axis=0)
    h = x @ w + b
    mu = jnp.mean(h, axis=-1, keepdims=True)
    var = jnp.mean((h - mu) ** 2, axis=-1, keepdims=True)
    hn = (h - mu) / jnp.sqrt(var + LN_EPS)
    return jnp.maximum(hn * gamma + beta, 0.0)


if __name__ == "__main__":
    num_tasks, embedding_dim, hidden_dim = 10, 32, 64
    B = 8
    V = num_tasks + 1

    key = jax.random.PRNGKey(0)
    k_emb, k_w, k_b, k_ids = jax.random.split(key, 4)

    # Deterministic synthetic parameters (shapes per __init__).
    table = jax.random.normal(k_emb, (V, embedding_dim), jnp.float32)
    # nn.Linear(embedding_dim, hidden_dim): PyTorch weight is [H, E]; we use [E, H].
    w = jax.random.normal(k_w, (embedding_dim, hidden_dim), jnp.float32) * 0.1
    b = jax.random.normal(k_b, (hidden_dim,), jnp.float32) * 0.1
    gamma = jnp.ones((hidden_dim,), jnp.float32)   # LayerNorm weight init
    beta = jnp.zeros((hidden_dim,), jnp.float32)   # LayerNorm bias init

    task_ids = jax.random.randint(k_ids, (B, 1), 0, V, dtype=jnp.int32)

    ref = task_encoder_ref(task_ids, table, w, b, gamma, beta)

    # Default (collapsed lookup-table) path: per-call work = one tiny gather kernel.
    encode = make_task_encoder(table, w, b, gamma, beta, precompute=True)
    out = jax.block_until_ready(encode(task_ids))
    np.testing.assert_allclose(np.asarray(out), np.asarray(ref), rtol=1e-5, atol=1e-5)

    # Fallback path: LayerNorm/ReLU computed inside the kernel (non-frozen params).
    encode_fused = make_task_encoder(table, w, b, gamma, beta, precompute=False)
    out2 = jax.block_until_ready(encode_fused(task_ids))
    np.testing.assert_allclose(np.asarray(out2), np.asarray(ref), rtol=1e-5, atol=1e-5)

    print("KERNEL_OK")
</pallas_src>

<mosaic_0001>
module attributes {stable_mosaic.version = 11 : i64} {
  func.func @_gather_rows_kernel(%arg0: memref<8xi32, #tpu.memory_space<smem>>, %arg1: memref<11x64xf32, #tpu.memory_space<vmem>>, %arg2: memref<8x64xf32, #tpu.memory_space<vmem>>) attributes {dimension_semantics = [], scalar_prefetch = 0 : i64, scratch_operands = 0 : i64, tpu.core_type = #tpu.core_type<tc>} {
    %c0 = arith.constant 0 : index
    %0 = memref.load %arg0[%c0] : memref<8xi32, #tpu.memory_space<smem>>
    %c0_i32 = arith.constant 0 : i32
    %c10_i32 = arith.constant 10 : i32
    %1 = arith.maxsi %c0_i32, %0 : i32
    %2 = arith.minsi %c10_i32, %1 : i32
    %3 = arith.index_cast %2 : i32 to index
    %c0_0 = arith.constant 0 : index
    %4 = vector.load %arg1[%3, %c0_0] : memref<11x64xf32, #tpu.memory_space<vmem>>, vector<1x64xf32>
    %c1 = arith.constant 1 : index
    %5 = memref.load %arg0[%c1] : memref<8xi32, #tpu.memory_space<smem>>
    %c0_i32_1 = arith.constant 0 : i32
    %c10_i32_2 = arith.constant 10 : i32
    %6 = arith.maxsi %c0_i32_1, %5 : i32
    %7 = arith.minsi %c10_i32_2, %6 : i32
    %8 = arith.index_cast %7 : i32 to index
    %c0_3 = arith.constant 0 : index
    %9 = vector.load %arg1[%8, %c0_3] : memref<11x64xf32, #tpu.memory_space<vmem>>, vector<1x64xf32>
    %c2 = arith.constant 2 : index
    %10 = memref.load %arg0[%c2] : memref<8xi32, #tpu.memory_space<smem>>
    %c0_i32_4 = arith.constant 0 : i32
    %c10_i32_5 = arith.constant 10 : i32
    %11 = arith.maxsi %c0_i32_4, %10 : i32
    %12 = arith.minsi %c10_i32_5, %11 : i32
    %13 = arith.index_cast %12 : i32 to index
    %c0_6 = arith.constant 0 : index
    %14 = vector.load %arg1[%13, %c0_6] : memref<11x64xf32, #tpu.memory_space<vmem>>, vector<1x64xf32>
    %c3 = arith.constant 3 : index
    %15 = memref.load %arg0[%c3] : memref<8xi32, #tpu.memory_space<smem>>
    %c0_i32_7 = arith.constant 0 : i32
    %c10_i32_8 = arith.constant 10 : i32
    %16 = arith.maxsi %c0_i32_7, %15 : i32
    %17 = arith.minsi %c10_i32_8, %16 : i32
    %18 = arith.index_cast %17 : i32 to index
    %c0_9 = arith.constant 0 : index
    %19 = vector.load %arg1[%18, %c0_9] : memref<11x64xf32, #tpu.memory_space<vmem>>, vector<1x64xf32>
    %c4 = arith.constant 4 : index
    %20 = memref.load %arg0[%c4] : memref<8xi32, #tpu.memory_space<smem>>
    %c0_i32_10 = arith.constant 0 : i32
    %c10_i32_11 = arith.constant 10 : i32
    %21 = arith.maxsi %c0_i32_10, %20 : i32
    %22 = arith.minsi %c10_i32_11, %21 : i32
    %23 = arith.index_cast %22 : i32 to index
    %c0_12 = arith.constant 0 : index
    %24 = vector.load %arg1[%23, %c0_12] : memref<11x64xf32, #tpu.memory_space<vmem>>, vector<1x64xf32>
    %c5 = arith.constant 5 : index
    %25 = memref.load %arg0[%c5] : memref<8xi32, #tpu.memory_space<smem>>
    %c0_i32_13 = arith.constant 0 : i32
    %c10_i32_14 = arith.constant 10 : i32
    %26 = arith.maxsi %c0_i32_13, %25 : i32
    %27 = arith.minsi %c10_i32_14, %26 : i32
    %28 = arith.index_cast %27 : i32 to index
    %c0_15 = arith.constant 0 : index
    %29 = vector.load %arg1[%28, %c0_15] : memref<11x64xf32, #tpu.memory_space<vmem>>, vector<1x64xf32>
    %c6 = arith.constant 6 : index
    %30 = memref.load %arg0[%c6] : memref<8xi32, #tpu.memory_space<smem>>
    %c0_i32_16 = arith.constant 0 : i32
    %c10_i32_17 = arith.constant 10 : i32
    %31 = arith.maxsi %c0_i32_16, %30 : i32
    %32 = arith.minsi %c10_i32_17, %31 : i32
    %33 = arith.index_cast %32 : i32 to index
    %c0_18 = arith.constant 0 : index
    %34 = vector.load %arg1[%33, %c0_18] : memref<11x64xf32, #tpu.memory_space<vmem>>, vector<1x64xf32>
    %c7 = arith.constant 7 : index
    %35 = memref.load %arg0[%c7] : memref<8xi32, #tpu.memory_space<smem>>
    %c0_i32_19 = arith.constant 0 : i32
    %c10_i32_20 = arith.constant 10 : i32
    %36 = arith.maxsi %c0_i32_19, %35 : i32
    %37 = arith.minsi %c10_i32_20, %36 : i32
    %38 = arith.index_cast %37 : i32 to index
    %c0_21 = arith.constant 0 : index
    %39 = vector.load %arg1[%38, %c0_21] : memref<11x64xf32, #tpu.memory_space<vmem>>, vector<1x64xf32>
    %40 = tpu.concatenate %4, %9, %14, %19, %24, %29, %34, %39 in 0 : vector<1x64xf32>, vector<1x64xf32>, vector<1x64xf32>, vector<1x64xf32>, vector<1x64xf32>, vector<1x64xf32>, vector<1x64xf32>, vector<1x64xf32> -> vector<8x64xf32>
    %c0_22 = arith.constant 0 : index
    %c0_23 = arith.constant 0 : index
    %41 = vector.load %arg2[%c0_22, %c0_23] : memref<8x64xf32, #tpu.memory_space<vmem>>, vector<8x64xf32>
    tpu.vector_store %arg2[%c0_22, %c0_23], %40 {strides = array<i32>} : memref<8x64xf32, #tpu.memory_space<vmem>>, vector<8x64xf32>,
    return
  }
}

</mosaic_0001>

<bundles_post_ra>
// kernel: encode.1
= control target key start
LH: loop header
LB: loop body
LE: loop exit
PB: predicated region body
PF: predicated region fallthrough
CT: control target
= control target key end

     0   :  { %7 = vsyncpa [#allocation5], 0  ;;  %s333_s0 = inlined_call_operand.hbm [shape: s32[8], index: 0, kind: input, shape index: {}]   ;;  %s334_s1 = inlined_call_operand.hbm [shape: f32[11,64], index: 1, kind: input, shape index: {}]   ;;  %s335_s2 = inlined_call_operand.hbm [shape: f32[8,64], index: 2, kind: output, shape index: {}]  }
   0x1   :  { %8 = vsyncpa [#allocation3], 0 }
   0x2   :  { %9 = vsyncpa [#allocation4], 0  ;;  %s15_s11 = sshll.u32 %s333_s0, 4  ;;  %s23_s14 = sshll.u32 %s334_s1, 4  ;;  %s16_s11 = int_to_ptr.hbm [resolvable:$true] %s15_s11  ;;  %s24_s14 = int_to_ptr.hbm [resolvable:$true] %s23_s14 }
   0x3   :  { %s294_s15 = smov [#allocation2]   ;;  %s295_s16 = smov [#allocation6]  }
   0x4   :  { %18 = dma.hbm_to_smem %s16_s11, 16, %s294_s15, [#allocation5]  }
   0x5   :  { %s25_s17 = sshll.u32 %s295_s16, 4  ;;  %s296_s18 = smov 128   ;;  %s26_s17 = int_to_ptr.vmem [resolvable:$true] %s25_s17 }
   0x6   :  { %s297_s19 = smov 8  }
   0x7   :  { %31 = dma.hbm_to_vmem [thread:$0]  %s24_s14, 256, %s26_s17, [#allocation3], %s296_s18, %s296_s18, %s297_s19  }
   0x8   :  { %288 = dma.done.wait [#allocation5], 16  }
   0x9   :  { %289 = vsyncadd [#allocation5], 4294967280 }
   0xa   :  { %290 = dma.done.wait [#allocation3], 256  }
   0xb   :  { %291 = vsyncadd [#allocation3], 4294967040 }
   0xc   :  { %40 = sfence }
   0xd   :  { %s41_s0 = sld [smem:[#allocation2]]  ;;  %vm118_vm0 = vcmask 1040384   ;;  %vm120_vm1 = vcmask 1041408   ;;  %vm122_vm2 = vcmask 1042432   ;;  %vm124_vm3 = vcmask 1043456   ;;  %s298_s6 = smov [#allocation7]  }
   0xe   :  { %s165_s20 = sld [smem:[#allocation2 + $0x1]]  ;;  %vm126_vm4 = vcmask 1044480   ;;  %vm128_vm5 = vcmask 1045504   ;;  %s139_s7 = sshll.u32 %s298_s6, 4  ;;  %vm130_vm6 = vcmask 1046528   ;;  %vm132_vm7 = vcmask 523264   ;;  %s140_s7 = int_to_ptr.vmem [resolvable:$true] %s139_s7 }
   0xf   :  { %s171_s21 = sld [smem:[#allocation2 + $0x2]]  ;;  %s141_s10 = sshll.u32 %s335_s2, 4  ;;  %s142_s10 = int_to_ptr.hbm [resolvable:$true] %s141_s10 }
  0x10   :  { %s177_s22 = sld [smem:[#allocation2 + $0x3]] }
  0x11   :  { %s320_s23 = sld [smem:[#allocation2 + $0x4]] }
  0x12   :  { %s322_s1 = sld [smem:[#allocation2 + $0x5]] }
  0x13   :  { %p42_p0 = scmp.gt.s32.totalorder %s41_s0, 0  ;;  %p160_p1 = scmp.lt.s32.totalorder %s41_s0, 10 }
  0x14   :  { %p49_p2 = scmp.gt.s32.totalorder %s165_s20, 0  ;;  %p166_p3 = scmp.lt.s32.totalorder %s165_s20, 10 }
  0x15   :  { %s337_s0 = smov (!%p42_p0, %s41_s0), 0  ;;  %p56_p4 = scmp.gt.s32.totalorder %s171_s21, 0 }
  0x16   :  { %s339_s20 = smov (!%p49_p2, %s165_s20), 0  ;;  %s341_s0 = smov (!%p160_p1, %s337_s0), 10 }
  0x17   :  { %s343_s20 = smov (!%p166_p3, %s339_s20), 10  ;;  %p172_p5 = scmp.lt.s32.totalorder %s171_s21, 10 }
  0x18   :  { %s345_s21 = smov (!%p56_p4, %s171_s21), 0  ;;  %p63_p6 = scmp.gt.s32.totalorder %s177_s22, 0 }
  0x19   :  { %p178_p7 = scmp.lt.s32.totalorder %s177_s22, 10  ;;  %s347_s21 = smov (!%p172_p5, %s345_s21), 10 }
  0x1a   :  { %s349_s22 = smov (!%p63_p6, %s177_s22), 0  ;;  %p70_p8 = scmp.gt.s32.totalorder %s320_s23, 0 }
  0x1b   :  { %s53_s24 = scalar_lea.vmem [#allocation6], %s343_s20  ;;  %s351_s22 = smov (!%p178_p7, %s349_s22), 10 }
  0x1c   :  { %v54_v0 = vld [vmem:[%s53_s24] sm:$0x1]  ;;  %s71_s25 = scalar_select %p70_p8, %s320_s23, 0 }
  0x1d   :  { %p184_p9 = scmp.lt.s32.totalorder %s320_s23, 10  ;;  %s60_s26 = scalar_lea.vmem [#allocation6], %s347_s21  ;;  %v98_v2 = vrot.slane %v54_v0, 7 }
  0x1e   :  { %v61_v1 = vld [vmem:[%s60_s26] sm:$0x1]  ;;  %p77_p10 = scmp.gt.s32.totalorder %s322_s1, 0  ;;  %p190_p11 = scmp.lt.s32.totalorder %s322_s1, 10 }
  0x1f   :  { %s46_s27 = scalar_lea.vmem [#allocation6], %s341_s0  ;;  %s353_s25 = smov (!%p184_p9, %s71_s25), 10  ;;  %v101_v5 = vrot.slane %v61_v1, 6 }
  0x20   :  { %v47_v3 = vld [vmem:[%s46_s27] sm:$0x1]  ;;  %s355_s1 = smov (!%p77_p10, %s322_s1), 0  ;;  %s67_s28 = scalar_lea.vmem [#allocation6], %s351_s22 }
  0x21   :  { %v68_v4 = vld [vmem:[%s67_s28] sm:$0x1]  ;;  %s195_s29 = sld [smem:[#allocation2 + $0x6]]  ;;  %s357_s1 = smov (!%p190_p11, %s355_s1), 10  ;;  %v119_v6 = vsel %vm118_vm0, %v47_v3, %v98_v2 }
  0x22   :  { %s201_s30 = sld [smem:[#allocation2 + $0x7]]  ;;  %s74_s3 = scalar_lea.vmem [#allocation6], %s353_s25  ;;  %v104_v8 = vrot.slane %v68_v4, 5  ;;  %v121_v9 = vsel %vm120_vm1, %v119_v6, %v101_v5 }
  0x23   :  { %v75_v7 = vld [vmem:[%s74_s3] sm:$0x1]  ;;  %s81_s4 = scalar_lea.vmem [#allocation6], %s357_s1 }
  0x24   :  { %v82_v10 = vld [vmem:[%s81_s4] sm:$0x1]  ;;  %v107_v11 = vrot.slane %v75_v7, 4  ;;  %v123_v12 = vsel %vm122_vm2, %v121_v9, %v104_v8 }
  0x25   :  { %v110_v13 = vrot.slane %v82_v10, 3 }
  0x26   :  { %v125_v14 = vsel %vm124_vm3, %v123_v12, %v107_v11 }
  0x27   :  { %p84_p12 = scmp.gt.s32.totalorder %s195_s29, 0  ;;  %p196_p13 = scmp.lt.s32.totalorder %s195_s29, 10  ;;  %v127_v16 = vsel %vm126_vm4, %v125_v14, %v110_v13 }
  0x28   :  { %p91_p0 = scmp.gt.s32.totalorder %s201_s30, 0  ;;  %p202_p1 = scmp.lt.s32.totalorder %s201_s30, 10 }
  0x29   :  { %s359_s29 = smov (!%p84_p12, %s195_s29), 0 }
  0x2a   :  { %s361_s29 = smov (!%p196_p13, %s359_s29), 10  ;;  %s363_s30 = smov (!%p91_p0, %s201_s30), 0 }
  0x2b   :  { %s88_s5 = scalar_lea.vmem [#allocation6], %s361_s29  ;;  %s365_s30 = smov (!%p202_p1, %s363_s30), 10 }
  0x2c   :  { %v89_v15 = vld [vmem:[%s88_s5] sm:$0x1]  ;;  %s95_s11 = scalar_lea.vmem [#allocation6], %s365_s30 }
  0x2d   :  { %v113_v17 = vrot.slane %v89_v15, 2  ;;  %v96_v18 = vld [vmem:[%s95_s11] sm:$0x1] }
  0x2e   :  { %v116_v20 = vrot.slane %v96_v18, 1 }
  0x2f   :  { %v129_v19 = vsel %vm128_vm5, %v127_v16, %v113_v17 }
  0x30   :  { %v131_v21 = vsel %vm130_vm6, %v129_v19, %v116_v20 }
  0x31   :  { %133 = vst.msk [vmem:[#allocation7] sm:$0xff] %vm132_vm7, %v131_v21 }
  0x32   :  { %144 = dma.vmem_to_hbm [thread:$0]  %s140_s7, 128, %s142_s10, [#allocation4]  }
  0x33   :  { %292 = dma.done.wait [#allocation4], 128  }
  0x34   :  { %293 = vsyncadd [#allocation4], 4294967168 }
  0x35   :  { %149 = vsyncpa [#allocation3], 1 }
  0x36   :  { %150 = vsyncpa [#allocation4], 1 }
  0x37   :  { %151 = vsyncpa [#allocation5], 1 }

</bundles_post_ra>
